<compile_context>
chip_gen: v7x
topology: tpu7x:2x2x1
jax: 0.10.0
libtpu: 0.0.40
codegen_flags: <defaults>
</compile_context>

<pallas_src>
import functools

import jax
import jax.numpy as jnp
import numpy as np
from jax.experimental import pallas as pl
from jax.experimental.pallas import tpu as pltpu


def _round_up(v, m):
    return ((v + m - 1) // m) * m


# ----------------------------------------------------------------------------
# Fused kernel: conv3x3 (im2col matmul) + ReLU + global-avg-pool + T2FNorm + fc
# ----------------------------------------------------------------------------
def fused_t2fnorm_kernel(xcol_ref, wconv_ref, bconv_ref, wfc_ref, bfc_ref,
                         logits_ref, penult_ref, *, inv_hw, tau, training):
    """One grid step = one image.

    xcol_ref:   [H*W, K_pad]   im2col input (bf16; K = 9*C zero-padded to 128)
    wconv_ref:  [K_pad, F_pad] conv weight, row = (ky*3+kx)*C + c   (bf16)
    bconv_ref:  [1, F_pad]     conv bias (f32)
    wfc_ref:    [F_pad, C_pad] new_fc weight, transposed + zero-padded (bf16)
    bfc_ref:    [1, C_pad]     new_fc bias (f32)
    logits_ref: [1, C_pad]     logits output
    penult_ref: [1, F_pad]     pooled (penultimate) features output
    """
    # Whole 3x3 conv for the image as ONE MXU matmul (M=H*W, K=9*C, N=F_pad).
    conv = jnp.dot(xcol_ref[...], wconv_ref[...],
                   preferred_element_type=jnp.float32)          # [H*W, F_pad] f32
    conv = jnp.maximum(conv + bconv_ref[...], 0.0)              # bias + ReLU
    pooled = jnp.sum(conv, axis=0, keepdims=True) * inv_hw      # global avg pool
    penult_ref[...] = pooled                                    # penultimate feats

    feat = pooled
    if training:
        # F.normalize(x, dim=-1): x / max(||x||, 1e-12)
        #   == x * rsqrt(max(||x||^2, 1e-24))   (EUP rsqrt, no divide chain)
        sq = jnp.sum(feat * feat, axis=-1, keepdims=True)
        feat = feat * jax.lax.rsqrt(jnp.maximum(sq, 1e-24))
    feat = feat * (1.0 / tau)
    logits = jnp.dot(feat.astype(jnp.bfloat16), wfc_ref[...],
                     preferred_element_type=jnp.float32)
    logits_ref[...] = logits + bfc_ref[...]


# ----------------------------------------------------------------------------
# Wrapper: cheap im2col / layout prep + single pallas_call
# ----------------------------------------------------------------------------
def t2fnorm_net_forward(x, params, *, tau, training=False, return_feature=False):
    N, C, H, W = x.shape
    F = params["conv_w"].shape[0]            # feature_size
    num_classes = params["fc_w"].shape[0]
    hw = H * W
    k9 = 9 * C
    k_pad = _round_up(k9, 128)               # lane-dense contraction dim
    f_pad = _round_up(F, 128)                # lane-dense feature dim
    c_pad = _round_up(num_classes, 128)      # lane-dense class dim

    # im2col in the wrapper (only ~hw*k_pad bf16 per image): NCHW -> padded
    # NHWC, 9 shifted slices concatenated along channels, pad K to 128, bf16.
    x_nhwc = jnp.transpose(x, (0, 2, 3, 1))
    x_p = jnp.pad(x_nhwc, ((0, 0), (1, 1), (1, 1), (0, 0)))
    taps = [x_p[:, ky:ky + H, kx:kx + W, :]
            for ky in range(3) for kx in range(3)]
    x_cols = jnp.concatenate(taps, axis=-1).reshape(N, hw, k9)
    x_cols = jnp.pad(x_cols, ((0, 0), (0, 0), (0, k_pad - k9))).astype(jnp.bfloat16)

    # Conv weight [F, C, 3, 3] -> [9*C, F] with row = (ky*3+kx)*C + c, padded.
    w_conv = jnp.transpose(params["conv_w"], (2, 3, 1, 0)).reshape(k9, F)
    w_conv = jnp.pad(w_conv, ((0, k_pad - k9), (0, f_pad - F))).astype(jnp.bfloat16)
    b_conv = jnp.pad(params["conv_b"], (0, f_pad - F)).reshape(1, f_pad)
    b_conv = b_conv.astype(jnp.float32)

    # new_fc: [num_classes, F] -> [F_pad, C_pad] (transposed, zero-padded), bf16.
    w_fc = jnp.pad(params["fc_w"].T,
                   ((0, f_pad - F), (0, c_pad - num_classes))).astype(jnp.bfloat16)
    b_fc = jnp.pad(params["fc_b"], (0, c_pad - num_classes)).reshape(1, c_pad)
    b_fc = b_fc.astype(jnp.float32)

    kernel = functools.partial(
        fused_t2fnorm_kernel, inv_hw=1.0 / float(hw), tau=float(tau),
        training=bool(training))

    logits_pad, penult_pad = pl.pallas_call(
        kernel,
        out_shape=(
            jax.ShapeDtypeStruct((N, 1, c_pad), jnp.float32),
            jax.ShapeDtypeStruct((N, 1, f_pad), jnp.float32),
        ),
        grid_spec=pltpu.PrefetchScalarGridSpec(
            num_scalar_prefetch=0,
            grid=(N,),
            in_specs=[
                pl.BlockSpec((None, hw, k_pad), lambda n: (n, 0, 0)),
                pl.BlockSpec((k_pad, f_pad), lambda n: (0, 0)),
                pl.BlockSpec((1, f_pad), lambda n: (0, 0)),
                pl.BlockSpec((f_pad, c_pad), lambda n: (0, 0)),
                pl.BlockSpec((1, c_pad), lambda n: (0, 0)),
            ],
            out_specs=[
                pl.BlockSpec((None, 1, c_pad), lambda n: (n, 0, 0)),
                pl.BlockSpec((None, 1, f_pad), lambda n: (n, 0, 0)),
            ],
        ),
        compiler_params=pltpu.CompilerParams(
            dimension_semantics=("parallel",)),
    )(x_cols, w_conv, b_conv, w_fc, b_fc)

    logits = logits_pad[:, 0, :num_classes]
    penult = penult_pad[:, 0, :F]
    if return_feature:
        return logits, penult
    return logits


# ----------------------------------------------------------------------------
# Pure-JAX reference (f32) and param init
# ----------------------------------------------------------------------------
def t2fnorm_ref(x, params, *, tau, training):
    y = jax.lax.conv_general_dilated(
        x, params["conv_w"], window_strides=(1, 1), padding=((1, 1), (1, 1)),
        dimension_numbers=("NCHW", "OIHW", "NCHW"))
    y = jnp.maximum(y + params["conv_b"][None, :, None, None], 0.0)
    pooled = jnp.mean(y, axis=(2, 3))                       # [N, F]
    feat = pooled
    if training:
        nrm = jnp.maximum(jnp.linalg.norm(feat, axis=-1, keepdims=True), 1e-12)
        feat = feat / nrm
    feat = feat / tau
    logits = feat @ params["fc_w"].T + params["fc_b"]
    return logits, pooled


def init_params(key, in_channels, feature_size, num_classes):
    k1, k2, k3, k4 = jax.random.split(key, 4)
    return {
        "conv_w": jax.random.normal(k1, (feature_size, in_channels, 3, 3), jnp.float32) * 0.1,
        "conv_b": jax.random.normal(k2, (feature_size,), jnp.float32) * 0.01,
        "fc_w": jax.random.normal(k3, (num_classes, feature_size), jnp.float32) * 0.1,
        "fc_b": jax.random.normal(k4, (num_classes,), jnp.float32) * 0.01,
    }


if __name__ == "__main__":
    key = jax.random.PRNGKey(0)
    kx_, kp = jax.random.split(key)

    N, C, H, W = 2, 4, 16, 16
    feature_size = 32
    num_classes = 8
    tau = 0.1

    x = jax.random.normal(kx_, (N, C, H, W), jnp.float32)
    params = init_params(kp, C, feature_size, num_classes)

    # eval path: features = pooled / tau
    logits_eval = t2fnorm_net_forward(x, params, tau=tau, training=False)
    # training path: features = F.normalize(pooled) / tau   (+ return_feature)
    logits_train, penult = t2fnorm_net_forward(
        x, params, tau=tau, training=True, return_feature=True)

    jax.block_until_ready(logits_eval)
    jax.block_until_ready(logits_train)
    jax.block_until_ready(penult)

    assert logits_eval.shape == (N, num_classes)
    assert logits_train.shape == (N, num_classes)
    assert penult.shape == (N, feature_size)

    # Numerical check vs f32 reference (conv + fc run in bf16 -> loose tol).
    ref_logits_eval, ref_pen = t2fnorm_ref(x, params, tau=tau, training=False)
    ref_logits_train, _ = t2fnorm_ref(x, params, tau=tau, training=True)
    np.testing.assert_allclose(np.asarray(logits_eval), np.asarray(ref_logits_eval),
                               rtol=5e-2, atol=5e-2)
    np.testing.assert_allclose(np.asarray(logits_train), np.asarray(ref_logits_train),
                               rtol=5e-2, atol=5e-2)
    np.testing.assert_allclose(np.asarray(penult), np.asarray(ref_pen),
                               rtol=5e-2, atol=5e-2)

    print("KERNEL_OK")
</pallas_src>

<mosaic_0001>
module attributes {stable_mosaic.version = 11 : i64} {
  func.func @fused_t2fnorm_kernel(%arg0: i32, %arg1: memref<1x256x128xbf16, #tpu.memory_space<vmem>>, %arg2: memref<128x128xbf16, #tpu.memory_space<vmem>>, %arg3: memref<1x128xf32, #tpu.memory_space<vmem>>, %arg4: memref<128x128xbf16, #tpu.memory_space<vmem>>, %arg5: memref<1x128xf32, #tpu.memory_space<vmem>>, %arg6: memref<1x1x128xf32, #tpu.memory_space<vmem>>, %arg7: memref<1x1x128xf32, #tpu.memory_space<vmem>>) attributes {dimension_semantics = [#tpu.dimension_semantics<parallel>], iteration_bounds = array<i64: 2>, scalar_prefetch = 0 : i64, scratch_operands = 0 : i64, tpu.core_type = #tpu.core_type<tc>, window_params = [{transform_indices = @transform_0, window_bounds = array<i64: 1, 256, 128>}, {pipeline_mode = #tpu.pipeline_mode<synchronous>, transform_indices = @transform_1, window_bounds = array<i64: 128, 128>}, {pipeline_mode = #tpu.pipeline_mode<synchronous>, transform_indices = @transform_2, window_bounds = array<i64: 1, 128>}, {pipeline_mode = #tpu.pipeline_mode<synchronous>, transform_indices = @transform_3, window_bounds = array<i64: 128, 128>}, {pipeline_mode = #tpu.pipeline_mode<synchronous>, transform_indices = @transform_4, window_bounds = array<i64: 1, 128>}, {transform_indices = @transform_5, window_bounds = array<i64: 1, 1, 128>}, {transform_indices = @transform_6, window_bounds = array<i64: 1, 1, 128>}]} {
    %c0 = arith.constant 0 : index
    %c0_0 = arith.constant 0 : index
    %c0_1 = arith.constant 0 : index
    %0 = vector.load %arg1[%c0, %c0_0, %c0_1] : memref<1x256x128xbf16, #tpu.memory_space<vmem>>, vector<1x256x128xbf16>
    %1 = vector.shape_cast %0 : vector<1x256x128xbf16> to vector<256x128xbf16>
    %c0_2 = arith.constant 0 : index
    %c0_3 = arith.constant 0 : index
    %2 = vector.load %arg2[%c0_2, %c0_3] : memref<128x128xbf16, #tpu.memory_space<vmem>>, vector<128x128xbf16>
    %cst = arith.constant dense<0.000000e+00> : vector<256x128xf32>
    %3 = tpu.matmul %1, %2, %cst {dimension_numbers = #tpu.dot_dimension_numbers<[1], [0], [0], [1], [0, 0, 1, 1], [], []>} : vector<256x128xbf16>, vector<128x128xbf16>, vector<256x128xf32> -> vector<256x128xf32>
    %c0_4 = arith.constant 0 : index
    %c0_5 = arith.constant 0 : index
    %4 = vector.load %arg3[%c0_4, %c0_5] : memref<1x128xf32, #tpu.memory_space<vmem>>, vector<1x128xf32>
    %5 = vector.broadcast %4 : vector<1x128xf32> to vector<256x128xf32>
    %6 = arith.addf %3, %5 : vector<256x128xf32>
    %cst_6 = arith.constant 0.000000e+00 : f32
    %7 = vector.broadcast %cst_6 : f32 to vector<256x128xf32>
    %8 = arith.maximumf %6, %7 : vector<256x128xf32>
    %cst_7 = arith.constant dense<0.000000e+00> : vector<128xf32>
    %9 = vector.multi_reduction <add>, %8, %cst_7 [0] : vector<256x128xf32> to vector<128xf32>
    %10 = vector.shape_cast %9 : vector<128xf32> to vector<1x128xf32>
    %cst_8 = arith.constant 3.906250e-03 : f32
    %11 = vector.broadcast %cst_8 : f32 to vector<1x128xf32>
    %12 = arith.mulf %10, %11 : vector<1x128xf32>
    %c0_9 = arith.constant 0 : index
    %c0_10 = arith.constant 0 : index
    %c0_11 = arith.constant 0 : index
    %13 = vector.load %arg7[%c0_9, %c0_10, %c0_11] : memref<1x1x128xf32, #tpu.memory_space<vmem>>, vector<1x1x128xf32>
    %14 = vector.shape_cast %13 : vector<1x1x128xf32> to vector<1x128xf32>
    %15 = vector.shape_cast %12 : vector<1x128xf32> to vector<1x1x128xf32>
    tpu.vector_store %arg7[%c0_9, %c0_10, %c0_11], %15 {strides = array<i32>} : memref<1x1x128xf32, #tpu.memory_space<vmem>>, vector<1x1x128xf32>,
    %cst_12 = arith.constant 1.000000e+01 : f32
    %16 = vector.broadcast %cst_12 : f32 to vector<1x128xf32>
    %17 = arith.mulf %12, %16 : vector<1x128xf32>
    %18 = arith.truncf %17 : vector<1x128xf32> to vector<1x128xbf16>
    %c0_13 = arith.constant 0 : index
    %c0_14 = arith.constant 0 : index
    %19 = vector.load %arg4[%c0_13, %c0_14] : memref<128x128xbf16, #tpu.memory_space<vmem>>, vector<128x128xbf16>
    %cst_15 = arith.constant dense<0.000000e+00> : vector<1x128xf32>
    %20 = tpu.matmul %18, %19, %cst_15 {dimension_numbers = #tpu.dot_dimension_numbers<[1], [0], [0], [1], [0, 0, 1, 1], [], []>} : vector<1x128xbf16>, vector<128x128xbf16>, vector<1x128xf32> -> vector<1x128xf32>
    %c0_16 = arith.constant 0 : index
    %c0_17 = arith.constant 0 : index
    %21 = vector.load %arg5[%c0_16, %c0_17] : memref<1x128xf32, #tpu.memory_space<vmem>>, vector<1x128xf32>
    %22 = arith.addf %20, %21 : vector<1x128xf32>
    %c0_18 = arith.constant 0 : index
    %c0_19 = arith.constant 0 : index
    %c0_20 = arith.constant 0 : index
    %23 = vector.load %arg6[%c0_18, %c0_19, %c0_20] : memref<1x1x128xf32, #tpu.memory_space<vmem>>, vector<1x1x128xf32>
    %24 = vector.shape_cast %23 : vector<1x1x128xf32> to vector<1x128xf32>
    %25 = vector.shape_cast %22 : vector<1x128xf32> to vector<1x1x128xf32>
    tpu.vector_store %arg6[%c0_18, %c0_19, %c0_20], %25 {strides = array<i32>} : memref<1x1x128xf32, #tpu.memory_space<vmem>>, vector<1x1x128xf32>,
    return
  }
  func.func @transform_0(%arg0: i32) -> (i32, i32, i32) {
    %c0_i32 = arith.constant 0 : i32
    %c0_i32_0 = arith.constant 0 : i32
    %c0_i32_1 = arith.constant 0 : i32
    return %arg0, %c0_i32, %c0_i32_0 : i32, i32, i32
  }
  func.func @transform_1(%arg0: i32) -> (i32, i32) {
    %c0_i32 = arith.constant 0 : i32
    %c0_i32_0 = arith.constant 0 : i32
    %c0_i32_1 = arith.constant 0 : i32
    return %c0_i32, %c0_i32_0 : i32, i32
  }
  func.func @transform_2(%arg0: i32) -> (i32, i32) {
    %c0_i32 = arith.constant 0 : i32
    %c0_i32_0 = arith.constant 0 : i32
    %c0_i32_1 = arith.constant 0 : i32
    return %c0_i32, %c0_i32_0 : i32, i32
  }
  func.func @transform_3(%arg0: i32) -> (i32, i32) {
    %c0_i32 = arith.constant 0 : i32
    %c0_i32_0 = arith.constant 0 : i32
    %c0_i32_1 = arith.constant 0 : i32
    return %c0_i32, %c0_i32_0 : i32, i32
  }
  func.func @transform_4(%arg0: i32) -> (i32, i32) {
    %c0_i32 = arith.constant 0 : i32
    %c0_i32_0 = arith.constant 0 : i32
    %c0_i32_1 = arith.constant 0 : i32
    return %c0_i32, %c0_i32_0 : i32, i32
  }
  func.func @transform_5(%arg0: i32) -> (i32, i32, i32) {
    %c0_i32 = arith.constant 0 : i32
    %c0_i32_0 = arith.constant 0 : i32
    %c0_i32_1 = arith.constant 0 : i32
    return %arg0, %c0_i32, %c0_i32_0 : i32, i32, i32
  }
  func.func @transform_6(%arg0: i32) -> (i32, i32, i32) {
    %c0_i32 = arith.constant 0 : i32
    %c0_i32_0 = arith.constant 0 : i32
    %c0_i32_1 = arith.constant 0 : i32
    return %arg0, %c0_i32, %c0_i32_0 : i32, i32, i32
  }
}

</mosaic_0001>

<bundles_post_ra>
// kernel: tpu_custom_call.1
= control target key start
LH: loop header
LB: loop body
LE: loop exit
PB: predicated region body
PF: predicated region fallthrough
CT: control target
= control target key end

     0   :  { %12 = vsyncpa [#allocation3], 0  ;;  %s1812_s0 = inlined_call_operand.hbm [shape: bf16[2,256,128], index: 0, kind: input, shape index: {}]   ;;  %s1813_s1 = inlined_call_operand.hbm [shape: bf16[128,128], index: 1, kind: input, shape index: {}]   ;;  %s1814_s2 = inlined_call_operand.vmem [shape: f32[1,128], index: 2, kind: input, shape index: {}]   ;;  %s1815_s3 = inlined_call_operand.hbm [shape: bf16[128,128], index: 3, kind: input, shape index: {}]   ;;  %s1816_s4 = inlined_call_operand.vmem [shape: f32[1,128], index: 4, kind: input, shape index: {}]   ;;  %s1817_s5 = inlined_call_operand.hbm [shape: f32[2,1,128], index: 5, kind: output, shape index: {0}]   ;;  %s1818_s6 = inlined_call_operand.hbm [shape: f32[2,1,128], index: 6, kind: output, shape index: {1}]  }
   0x1   :  { %14 = vsyncpa [#allocation3 + $0x1], 0 }
   0x2   :  { %15 = vsyncpa [#allocation6], 0 }
   0x3   :  { %16 = vsyncpa [#allocation4], 0 }
   0x4   :  { %18 = vsyncpa [#allocation4 + $0x1], 0 }
   0x5   :  { %19 = vsyncpa [#allocation10], 0 }
   0x6   :  { %21 = vsyncpa [#allocation10 + $0x1], 0  ;;  %s1484_s21 = smov 0   ;;  %s1486_s22 = smov 0  }
   0x7   :  { %s1488_s23 = smov 0   ;;  %s1490_s24 = smov 0  }
   0x8 LB: > { %s1505_s25 = sadd.s32 4294967295, %s1438_s24   ;;  %s991_s26 = sadd.s32 4294967294, %s1438_s24   ;;  %s1438_s24 = sphi %s1490_s24, %s1838_s24   ;;  %s1434_s23 = sphi %s1488_s23, %s1837_s23   ;;  %s1430_s22 = sphi %s1486_s22, %s1836_s22   ;;  %s1426_s21 = sphi %s1484_s21, %s1835_s21  }
   0x9   : > { %p47_p0 = scmp.ne.s32.totalorder %s1430_s22, %s1426_s21  ;;  %p1819_p1 = scmp.eq.s32.totalorder %s1505_s25, 0 }
   0xa   : > { %p161_p3 = scmp.eq.s32.totalorder %s991_s26, 1  ;;  %p992_p5 = scmp.ge.s32.totalorder %s1438_s24, 1 }
   0xb   : > { %p1514_p4 = por %p1819_p1, %p47_p0  ;;  %p194_p7 = scmp.lt.s32.totalorder %s1438_s24, 3 }
   0xc   : > { %p1519_p6 = por %p161_p3, %p47_p0  ;;  %s1440_s30 = smov [#allocation5]  }
   0xd   : > { %s1822_s27 = scalar_select %p1514_p4, 1, 0 }
   0xe   : > { %s1823_s28 = scalar_select %p1519_p6, 1, 0 }
   0xf   : > { %p1524_p8 = pnand %p992_p5, %p194_p7  ;;  %s206_s7 = sshll.u32 %s1440_s30, 4  ;;  %s1528_s7 = int_to_ptr.vmem [resolvable:$true] %s206_s7 }
  0x10   : > { %s1441_s9 = smov [#allocation7]   ;;  %s1250_s13 = scalar_lea.hbm %s1813_s1, 1024 }
  0x11   : > { %p1156_p9 = pneg %p1524_p8  ;;  %s222_s10 = sshll.u32 %s1441_s9, 4  ;;  %s1539_s10 = int_to_ptr.vmem [resolvable:$true] %s222_s10 }
  0x12   : > { %p1251_p12 = scmp.ne.s32.totalorder %s1813_s1, %s1250_s13  ;;  %p1257_p5 = scmp.lt.u32.totalorder %s1250_s13, %s1813_s1 }
  0x13   : > { %p1535_p11 = pnand %p1156_p9, %p1819_p1 }
  0x15   : > { %p1252_p13 = pneg %p1535_p11 }
  0x17   : > { %p1253_p0 = pnand %p1252_p13, %p1251_p12 }
  0x19   : > { %p1254_p3 = pneg %p1253_p0 }
  0x1b   : > { %p1259_p7 = pnand %p1257_p5, %p1254_p3 }
  0x1d   : > { %1262 = shalt.err (!%p1259_p7)
}
  0x1e   : > { %s1263_s18 = scalar_lea.vmem %s1528_s7, 1024  ;;  %p1271_p2 = scmp.lt.s32.totalorder %s1528_s7, %s1528_s7 }
  0x1f   : > { %p1264_p9 = scmp.ne.s32.totalorder %s1528_s7, %s1263_s18  ;;  %p1272_p12 = scmp.lt.s32.totalorder %s1263_s18, %s1263_s18 }
  0x21   : > { %p1266_p10 = pnand %p1264_p9, %p1252_p13  ;;  %p1273_p0 = por %p1272_p12, %p1271_p2 }
  0x23   : > { %p1267_p1 = pneg %p1266_p10 }
  0x25   : > { %p1274_p6 = pnand %p1273_p0, %p1267_p1 }
  0x27   : > { %1277 = shalt.err (!%p1274_p6)
}
  0x28   : > { %s1442_s19 = smov 64   ;;  %s1443_s20 = smov 4  }
  0x29   : > { %1159 = dma.hbm_to_vmem [thread:$0]  (!%p1535_p11), %s1813_s1, 1024, %s1528_s7, [#allocation6], %s1442_s19, %s1442_s19, %s1443_s20  }
  0x2a   : > { %s1278_s12 = scalar_lea.hbm %s1815_s3, 1024 }
  0x2b   : > { %p1279_p1 = scmp.ne.s32.totalorder %s1815_s3, %s1278_s12  ;;  %p1285_p10 = scmp.lt.u32.totalorder %s1278_s12, %s1815_s3 }
  0x2d   : > { %p1281_p2 = pnand %p1279_p1, %p1252_p13 }
  0x2f   : > { %p1282_p6 = pneg %p1281_p2 }
  0x31   : > { %p1287_p3 = pnand %p1285_p10, %p1282_p6 }
  0x33   : > { %1290 = shalt.err (!%p1287_p3)
}
  0x34   : > { %s1291_s7 = scalar_lea.vmem %s1539_s10, 1024  ;;  %p1299_p12 = scmp.lt.s32.totalorder %s1539_s10, %s1539_s10 }
  0x35   : > { %p1292_p5 = scmp.ne.s32.totalorder %s1539_s10, %s1291_s7  ;;  %p1300_p0 = scmp.lt.s32.totalorder %s1291_s7, %s1291_s7 }
  0x37   : > { %p1294_p7 = pnand %p1292_p5, %p1252_p13  ;;  %p1301_p1 = por %p1300_p0, %p1299_p12 }
  0x39   : > { %p1295_p9 = pneg %p1294_p7 }
  0x3b   : > { %p1302_p2 = pnand %p1301_p1, %p1295_p9 }
  0x3d   : > { %1305 = shalt.err (!%p1302_p2)
}
  0x3e   : > { %1162 = dma.hbm_to_vmem [thread:$0]  (!%p1535_p11), %s1815_s3, 1024, %s1539_s10, [#allocation6], %s1442_s19, %s1442_s19, %s1443_s20  }
  0x3f   : > { %s1600_s8 = sadd.s32 1, %s1438_s24   ;;  %s34_s26 = sadd.s32 1, %s1434_s23 }
  0x40   : > { %s31_s30 = ssub.s32 %s1438_s24, %s1600_s8  ;;  %p41_p13 = scmp.ne.s32.totalorder %s1434_s23, %s1430_s22 }
  0x41   : > { %p32_p6 = scmp.eq.s32.totalorder %s31_s30, 0  ;;  %p42_p10 = scmp.eq.s32.totalorder %s1438_s24, 0 }
  0x42   : > { %p1826_p3 = scmp.eq.s32.totalorder %s1505_s25, 1  ;;  %p1176_p7 = scmp.lt.s32.totalorder %s1438_s24, 2 }
  0x43   : > { %s1616_s11 = scalar_select %p32_p6, %s1434_s23, %s34_s26  }
  0x44   : > { %p1610_p5 = por %p1826_p3, %p41_p13  ;;  %p43_p9 = por %p42_p10, %p41_p13 }
  0x45   : > { %s239_s12 = sand.u32 1, %s1434_s23   ;;  %s1040_s10 = sshll.u32 %s1438_s24, 11 }
  0x46   : > { %s1827_s9 = scalar_select %p1610_p5, 1, 0 }
  0x47   : > { %s996_s13 = sshll.u32 %s239_s12, 7  ;;  %s1623_s16 = scalar_lea.hbm %s1812_s0, %s1040_s10 }
  0x48   : > { %s243_s7 = scalar_lea.vmem [#allocation2], %s996_s13  ;;  %p1627_p11 = pnand %p1176_p7, %p43_p9 }
  0x49   : > { %s250_s17 = sshll.u32 %s243_s7, 4  ;;  %s1631_s26 = scalar_lea.sflag [#allocation3], %s239_s12  ;;  %s1625_s17 = int_to_ptr.vmem [resolvable:$true] %s250_s17 }
  0x4a   : > { %s1306_s30 = scalar_lea.hbm %s1623_s16, 2048  ;;  %p1308_p0 = pneg %p1627_p11 }
  0x4b   : > { %p1307_p12 = scmp.ne.s32.totalorder %s1623_s16, %s1306_s30  ;;  %s1311_s14 = scalar_lea.hbm %s1812_s0, 4096 }
  0x4c   : > { %p1312_p13 = scmp.lt.u32.totalorder %s1623_s16, %s1812_s0  ;;  %p1313_p6 = scmp.lt.u32.totalorder %s1311_s14, %s1306_s30 }
  0x4d   : > { %p1309_p1 = pnand %p1308_p0, %p1307_p12  ;;  %p1315_p3 = scmp.lt.u32.totalorder %s1306_s30, %s1623_s16 }
  0x4e   : > { %p1314_p10 = por %p1313_p6, %p1312_p13 }
  0x4f   : > { %p1310_p2 = pneg %p1309_p1 }
  0x50   : > { %p1316_p7 = por %p1315_p3, %p1314_p10 }
  0x52   : > { %p1317_p9 = pnand %p1316_p7, %p1310_p2 }
  0x54   : > { %1320 = shalt.err (!%p1317_p9)
}
  0x55   : > { %s1321_s12 = scalar_lea.vmem %s1625_s17, 2048  ;;  %s1444_s13 = smov [#allocation2]  }
  0x56   : > { %p1322_p12 = scmp.ne.s32.totalorder %s1625_s17, %s1321_s12  ;;  %s1326_s10 = sshll.u32 %s1444_s13, 4  ;;  %s1327_s10 = int_to_ptr.vmem [resolvable:$false] %s1326_s10 }
  0x57   : > { %s1328_s15 = scalar_lea.vmem %s1327_s10, 4096  ;;  %p1329_p4 = scmp.lt.s32.totalorder %s1625_s17, %s1327_s10 }
  0x58   : > { %p1324_p1 = pnand %p1322_p12, %p1308_p0  ;;  %p1330_p13 = scmp.lt.s32.totalorder %s1328_s15, %s1321_s12 }
  0x5a   : > { %p1325_p5 = pneg %p1324_p1  ;;  %p1331_p6 = por %p1330_p13, %p1329_p4 }
  0x5c   : > { %p1332_p10 = pnand %p1331_p6, %p1325_p5 }
  0x5e   : > { %1335 = shalt.err (!%p1332_p10)
}
  0x5f   : > { %1166 = dma.hbm_to_vmem [thread:$0]  (!%p1627_p11), %s1623_s16, 2048, %s1625_s17, %s1631_s26, %s1442_s19, %s1442_s19, %s1443_s20  }
  0x60   : > { %262 = sbr.rel (%p1524_p8) target bundleno = 667 (0x29b), region = 40  ;;  %s1665_s30 = sand.u32 (!%p1524_p8), 1, %s1430_s22  }
  0x61   : > { %s1000_s14 = sshll.u32 (!%p1524_p8), %s1665_s30, 7  ;;  %s265_s7 = scalar_lea.sflag (!%p1524_p8), [#allocation3], %s1665_s30 }
  0x62   : > { %s1669_s12 = scalar_lea.vmem (!%p1524_p8), [#allocation2], %s1000_s14  ;;  %p1829_p4 = scmp.ne.s32.totalorder (!%p1524_p8), %s1822_s27, 0 }
  0x67   : > { %1409 = dma.done.wait (%p1829_p4), %s265_s7, 2048  }
  0x68   : > { %1411 = vsyncadd (%p1829_p4), %s265_s7, 4294965248  ;;  %p1830_p5 = scmp.eq.s32.totalorder %s1505_s25, 0 }
  0x6a   : > { %1413 = dma.done.wait (%p1830_p5), [#allocation6], 2048   ;;  %p1831_p8 = pmov %p1830_p5 }
  0x6b   : > { %v1218_v0 = vld [vmem:[#allocation5] sm:$0xff]   ;;  %v1219_v1 = vld [vmem:[#allocation5 + $0x8] sm:$0xff]   ;;  %v1220_v2 = vld [vmem:[#allocation5 + $0x10] sm:$0xff]   ;;  %v1445_v25 = vmov 0.0   ;;  %vm1446_vm0 = vmmov 0   ;;  %s307_s19 = scalar_lea.vmem [#allocation9], %s1665_s30 }
  0x6c   : > { %1415 = vsyncadd (%p1831_p8), [#allocation6], 4294965248  ;;  %1074 = vmatprep.subr.bf16.mxu0 %v1218_v0  ;;  %v1221_v3 = vld [vmem:[#allocation5 + $0x18] sm:$0xff]   ;;  %v1226_v4 = vld [vmem:[%s1669_s12] sm:$0xff]   ;;  %1122 = vmatprep.subr.bf16.mxu1 %v1445_v25  ;;  %s1036_s20 = sshll.u32 %s1505_s25, 4  ;;  %s878_s26 = sshll.u32 %s307_s19, 4  ;;  %s879_s26 = int_to_ptr.vmem [resolvable:$true] %s878_s26 }
  0x6d   : > { %1075 = vmatpush3.bf16.msra.mxu0 %v1218_v0  ;;  %1090 = vmatprep.mubr.bf16.mxu0 %v1226_v4  ;;  %v1222_v5 = vld [vmem:[#allocation5 + $0x20] sm:$0xff]   ;;  %v1223_v6 = vld [vmem:[#allocation5 + $0x28] sm:$0xff]   ;;  %v1224_v7 = vld [vmem:[#allocation5 + $0x30] sm:$0xff]   ;;  %s1739_s18 = scalar_lea.hbm %s1818_s6, %s1036_s20  ;;  %s853_s13 = scalar_lea.sflag [#allocation10], %s1665_s30 }
  0x6e   : > { %1076 = vmatprep.subr.bf16.mxu0 %v1219_v1  ;;  %v1225_v8 = vld [vmem:[#allocation5 + $0x38] sm:$0xff]   ;;  %v1227_v9 = vld [vmem:[%s1669_s12 + $0x8] sm:$0xff]   ;;  %v1228_v10 = vld [vmem:[%s1669_s12 + $0x10] sm:$0xff]   ;;  %1138 = vmatprep.mubr.msk.bf16.mxu1 %vm1446_vm0, %v1445_v25  ;;  %s1336_s10 = scalar_lea.vmem %s879_s26, 16  ;;  %p1832_p0 = scmp.ne.s32.totalorder %s1827_s9, 0 }
  0x6f   : > { %v1229_v11 = vld [vmem:[%s1669_s12 + $0x18] sm:$0xff]   ;;  %v1230_v12 = vld [vmem:[%s1669_s12 + $0x20] sm:$0xff]   ;;  %v1231_v13 = vld [vmem:[%s1669_s12 + $0x28] sm:$0xff]   ;;  %p1337_p11 = scmp.ne.s32.totalorder %s879_s26, %s1336_s10  ;;  %s1447_s15 = smov [#allocation9]  }
  0x70   : > { %v1232_v14 = vld [vmem:[%s1669_s12 + $0x30] sm:$0xff]   ;;  %v1233_v15 = vld [vmem:[%s1669_s12 + $0x38] sm:$0xff]   ;;  %v1234_v16 = vld [vmem:[%s1669_s12 + $0x40] sm:$0xff]   ;;  %s1340_s14 = sshll.u32 %s1447_s15, 4  ;;  %s1341_s14 = int_to_ptr.vmem [resolvable:$false] %s1340_s14 }
  0x71   : > { %1077 = vmatpush3.bf16.msra.mxu0 %v1219_v1  ;;  %v1235_v17 = vld [vmem:[%s1669_s12 + $0x48] sm:$0xff]   ;;  %v1236_v18 = vld [vmem:[%s1669_s12 + $0x50] sm:$0xff]   ;;  %v1237_v19 = vld [vmem:[%s1669_s12 + $0x58] sm:$0xff]   ;;  %p1338_p2 = pnand %p1337_p11, %p1832_p0  ;;  %s1342_s7 = scalar_lea.vmem %s1341_s14, 32 }
  0x72   : > { %1078 = vmatprep.subr.bf16.mxu0 %v1220_v2  ;;  %v1238_v20 = vld [vmem:[%s1669_s12 + $0x60] sm:$0xff]   ;;  %v1239_v21 = vld [vmem:[%s1669_s12 + $0x68] sm:$0xff]   ;;  %v1240_v22 = vld [vmem:[%s1669_s12 + $0x70] sm:$0xff]   ;;  %p1343_p7 = scmp.lt.s32.totalorder %s879_s26, %s1341_s14  ;;  %p1344_p9 = scmp.lt.s32.totalorder %s1342_s7, %s1336_s10 }
  0x73   : > { %v1241_v23 = vld [vmem:[%s1669_s12 + $0x78] sm:$0xff]   ;;  %v1242_v24 = vld [vmem:[#allocation7] sm:$0xff]   ;;  %v1243_v26 = vld [vmem:[#allocation7 + $0x8] sm:$0xff]   ;;  %p1339_p3 = pneg %p1338_p2 }
  0x74   : > { %1123 = vmatpush3.bf16.msra.mxu1 %v1242_v24  ;;  %v1244_v27 = vld [vmem:[#allocation7 + $0x10] sm:$0xff]   ;;  %v1245_v28 = vld [vmem:[#allocation7 + $0x18] sm:$0xff]   ;;  %v1246_v29 = vld [vmem:[#allocation7 + $0x20] sm:$0xff]   ;;  %p1345_p12 = por %p1344_p9, %p1343_p7 }
  0x75   : > { %1079 = vmatpush3.bf16.msra.mxu0 %v1220_v2  ;;  %1124 = vmatprep.subr.bf16.mxu1 %v1445_v25  ;;  %v1247_v30 = vld [vmem:[#allocation7 + $0x28] sm:$0xff]   ;;  %v1248_v31 = vld [vmem:[#allocation7 + $0x30] sm:$0xff]   ;;  %v1249_v32 = vld [vmem:[#allocation7 + $0x38] sm:$0xff]  }
  0x76   : > { %1080 = vmatprep.subr.bf16.mxu0 %v1221_v3  ;;  %v1698_v33 = vld [vmem:[%s1814_s2] ss:$0 sm:$0xff]  ;;  %p1346_p1 = pnand %p1345_p12, %p1339_p3 }
  0x78   : > { %1125 = vmatpush3.bf16.msra.mxu1 %v1243_v26 }
  0x79   : > { %1081 = vmatpush3.bf16.msra.mxu0 %v1221_v3  ;;  %1126 = vmatprep.subr.bf16.mxu1 %v1445_v25 }
  0x7a   : > { %1082 = vmatprep.subr.bf16.mxu0 %v1222_v5 }
  0x7c   : > { %1127 = vmatpush3.bf16.msra.mxu1 %v1244_v27 }
  0x7d   : > { %1083 = vmatpush3.bf16.msra.mxu0 %v1222_v5  ;;  %1128 = vmatprep.subr.bf16.mxu1 %v1445_v25 }
  0x7e   : > { %1084 = vmatprep.subr.bf16.mxu0 %v1223_v6 }
  0x80   : > { %1129 = vmatpush3.bf16.msra.mxu1 %v1245_v28 }
  0x81   : > { %1085 = vmatpush3.bf16.msra.mxu0 %v1223_v6  ;;  %1130 = vmatprep.subr.bf16.mxu1 %v1445_v25 }
  0x82   : > { %1086 = vmatprep.subr.bf16.mxu0 %v1224_v7 }
  0x84   : > { %1131 = vmatpush3.bf16.msra.mxu1 %v1246_v29 }
  0x85   : > { %1087 = vmatpush3.bf16.msra.mxu0 %v1224_v7  ;;  %1132 = vmatprep.subr.bf16.mxu1 %v1445_v25 }
  0x86   : > { %1088 = vmatprep.subr.bf16.mxu0 %v1225_v8 }
  0x88   : > { %1133 = vmatpush3.bf16.msra.mxu1 %v1247_v30 }
  0x89   : > { %1089 = vmatpush3.bf16.msra.mxu0 %v1225_v8  ;;  %1134 = vmatprep.subr.bf16.mxu1 %v1445_v25 }
  0x8c   : > { %1091 = vmatmul.mubr.bf16.vlgmr.msra.gmra.mrb[0].mxu0 %v1227_v9  ;;  %1135 = vmatpush3.bf16.msra.mxu1 %v1248_v31 }
  0x8d   : > { %1094 = vmatprep.mubr.bf16.mxu0 %v1228_v10  ;;  %1136 = vmatprep.subr.bf16.mxu1 %v1445_v25 }
  0x90   : > { %1137 = vmatpush3.bf16.msra.mxu1 %v1249_v32 }
  0x94   : > { %1095 = vmatmul.mubr.bf16.gmra.mrb[4].mxu0 %v1229_v11 }
  0x95   : > { %1098 = vmatprep.mubr.bf16.mxu0 %v1230_v12 }
  0x9c   : > { %1099 = vmatmul.mubr.bf16.gmra.mrb[8].mxu0 %v1231_v13 }
  0x9d   : > { %1102 = vmatprep.mubr.bf16.mxu0 %v1232_v14 }
  0xa4   : > { %1103 = vmatmul.mubr.bf16.gmra.mrb[12].mxu0 %v1233_v15 }
  0xa5   : > { %1106 = vmatprep.mubr.bf16.mxu0 %v1234_v16 }
  0xac   : > { %1107 = vmatmul.mubr.bf16.gmra.mrb[16].mxu0 %v1235_v17 }
  0xad   : > { %1110 = vmatprep.mubr.bf16.mxu0 %v1236_v18 }
  0xb4   : > { %1111 = vmatmul.mubr.bf16.gmra.mrb[20].mxu0 %v1237_v19 }
  0xb5   : > { %1114 = vmatprep.mubr.bf16.mxu0 %v1238_v20 }
  0xbc   : > { %1115 = vmatmul.mubr.bf16.gmra.mrb[24].mxu0 %v1239_v21 }
  0xbd   : > { %1118 = vmatprep.mubr.bf16.mxu0 %v1240_v22 }
  0xc4   : > { %1119 = vmatmul.mubr.bf16.gmra.mrb[28].mxu0 %v1241_v23 }
 0x15f   : > { %v1092_v34 = vpop.f32.mrb[0].mxu0 }
 0x160   : > { %v542_v35 = vpop.f32.mrb[1].mxu0  ;;  %v551_v39 = vadd.f32 %v1092_v34, %v1698_v33 }
 0x161   : > { %v543_v36 = vadd.f32 %v1698_v33, %v542_v35  ;;  %v1093_v37 = vpop.f32.mrb[2].mxu0 }
 0x162   : > { %v545_v38 = vpop.f32.mrb[3].mxu0  ;;  %v554_v42 = vadd.f32 %v1093_v37, %v1698_v33  ;;  %v671_v44 = vmax.f32 %v551_v39, 0.0 }
 0x163   : > { %v546_v40 = vadd.f32 %v1698_v33, %v545_v38  ;;  %v669_v41 = vmax.f32 %v543_v36, 0.0 }
 0x164   : > { %v672_v48 = vmax.f32 %v554_v42, 0.0 }
 0x165   : > { %v670_v43 = vmax.f32 %v546_v40, 0.0 }
 0x167   : > { %v701_v45 = vadd.f32 %v670_v43, %v669_v41  ;;  %v1096_v46 = vpop.f32.mrb[4].mxu0 }
 0x168   : > { %v558_v47 = vpop.f32.mrb[5].mxu0  ;;  %v567_v53 = vadd.f32 %v1096_v46, %v1698_v33 }
 0x169   : > { %v702_v49 = vadd.f32 %v701_v45, %v671_v44  ;;  %v559_v50 = vadd.f32 %v1698_v33, %v558_v47  ;;  %v1097_v51 = vpop.f32.mrb[6].mxu0 }
 0x16a   : > { %v561_v52 = vpop.f32.mrb[7].mxu0  ;;  %v570_v58 = vadd.f32 %v1097_v51, %v1698_v33  ;;  %v675_v60 = vmax.f32 %v567_v53, 0.0 }
 0x16b   : > { %v673_v54 = vmax.f32 %v559_v50, 0.0  ;;  %v703_v55 = vadd.f32 %v702_v49, %v672_v48  ;;  %v562_v56 = vadd.f32 %v1698_v33, %v561_v52 }
 0x16c   : > { %v676_v0 = vmax.f32 %v570_v58, 0.0 }
 0x16d   : > { %v704_v57 = vadd.f32 %v703_v55, %v673_v54  ;;  %v674_v59 = vmax.f32 %v562_v56, 0.0 }
 0x16f   : > { %v705_v61 = vadd.f32 %v704_v57, %v674_v59  ;;  %v1100_v62 = vpop.f32.mrb[8].mxu0 }
 0x170   : > { %v574_v63 = vpop.f32.mrb[9].mxu0  ;;  %v583_v5 = vadd.f32 %v1100_v62, %v1698_v33 }
 0x171   : > { %v706_v1 = vadd.f32 %v705_v61, %v675_v60  ;;  %v575_v2 = vadd.f32 %v1698_v33, %v574_v63  ;;  %v1101_v3 = vpop.f32.mrb[10].mxu0 }
 0x172   : > { %v577_v4 = vpop.f32.mrb[11].mxu0  ;;  %v586_v10 = vadd.f32 %v1101_v3, %v1698_v33  ;;  %v679_v12 = vmax.f32 %v583_v5, 0.0 }
 0x173   : > { %v677_v6 = vmax.f32 %v575_v2, 0.0  ;;  %v707_v7 = vadd.f32 %v706_v1, %v676_v0  ;;  %v578_v8 = vadd.f32 %v1698_v33, %v577_v4 }
 0x174   : > { %v680_v16 = vmax.f32 %v586_v10, 0.0 }
 0x175   : > { %v708_v9 = vadd.f32 %v707_v7, %v677_v6  ;;  %v678_v11 = vmax.f32 %v578_v8, 0.0 }
 0x177   : > { %v709_v13 = vadd.f32 %v708_v9, %v678_v11  ;;  %v1104_v14 = vpop.f32.mrb[12].mxu0 }
 0x178   : > { %v590_v15 = vpop.f32.mrb[13].mxu0  ;;  %v599_v21 = vadd.f32 %v1104_v14, %v1698_v33 }
 0x179   : > { %v710_v17 = vadd.f32 %v709_v13, %v679_v12  ;;  %v591_v18 = vadd.f32 %v1698_v33, %v590_v15  ;;  %v1105_v19 = vpop.f32.mrb[14].mxu0 }
 0x17a   : > { %v593_v20 = vpop.f32.mrb[15].mxu0  ;;  %v602_v26 = vadd.f32 %v1105_v19, %v1698_v33  ;;  %v683_v28 = vmax.f32 %v599_v21, 0.0 }
 0x17b   : > { %v681_v22 = vmax.f32 %v591_v18, 0.0  ;;  %v711_v23 = vadd.f32 %v710_v17, %v680_v16  ;;  %v594_v24 = vadd.f32 %v1698_v33, %v593_v20 }
 0x17c   : > { %v684_v32 = vmax.f32 %v602_v26, 0.0 }
 0x17d   : > { %v712_v25 = vadd.f32 %v711_v23, %v681_v22  ;;  %v682_v27 = vmax.f32 %v594_v24, 0.0 }
 0x17f   : > { %v713_v29 = vadd.f32 %v712_v25, %v682_v27  ;;  %v1108_v30 = vpop.f32.mrb[16].mxu0 }
 0x180   : > { %v606_v31 = vpop.f32.mrb[17].mxu0  ;;  %v615_v38 = vadd.f32 %v1108_v30, %v1698_v33 }
 0x181   : > { %v714_v34 = vadd.f32 %v713_v29, %v683_v28  ;;  %v607_v35 = vadd.f32 %v1698_v33, %v606_v31  ;;  %v1109_v36 = vpop.f32.mrb[18].mxu0 }
 0x182   : > { %v609_v37 = vpop.f32.mrb[19].mxu0  ;;  %v618_v43 = vadd.f32 %v1109_v36, %v1698_v33  ;;  %v687_v45 = vmax.f32 %v615_v38, 0.0 }
 0x183   : > { %v685_v39 = vmax.f32 %v607_v35, 0.0  ;;  %v715_v40 = vadd.f32 %v714_v34, %v684_v32  ;;  %v610_v41 = vadd.f32 %v1698_v33, %v609_v37 }
 0x184   : > { %v688_v49 = vmax.f32 %v618_v43, 0.0 }
 0x185   : > { %v716_v42 = vadd.f32 %v715_v40, %v685_v39  ;;  %v686_v44 = vmax.f32 %v610_v41, 0.0 }
 0x187   : > { %v717_v46 = vadd.f32 %v716_v42, %v686_v44  ;;  %v1112_v47 = vpop.f32.mrb[20].mxu0 }
 0x188   : > { %v622_v48 = vpop.f32.mrb[21].mxu0  ;;  %v631_v54 = vadd.f32 %v1112_v47, %v1698_v33 }
 0x189   : > { %v718_v50 = vadd.f32 %v717_v46, %v687_v45  ;;  %v623_v51 = vadd.f32 %v1698_v33, %v622_v48  ;;  %v1113_v52 = vpop.f32.mrb[22].mxu0 }
 0x18a   : > { %v625_v53 = vpop.f32.mrb[23].mxu0  ;;  %v634_v59 = vadd.f32 %v1113_v52, %v1698_v33  ;;  %v691_v61 = vmax.f32 %v631_v54, 0.0 }
 0x18b   : > { %v689_v55 = vmax.f32 %v623_v51, 0.0  ;;  %v719_v56 = vadd.f32 %v718_v50, %v688_v49  ;;  %v626_v57 = vadd.f32 %v1698_v33, %v625_v53 }
 0x18c   : > { %v692_v1 = vmax.f32 %v634_v59, 0.0 }
 0x18d   : > { %v720_v58 = vadd.f32 %v719_v56, %v689_v55  ;;  %v690_v60 = vmax.f32 %v626_v57, 0.0 }
 0x18f   : > { %v721_v62 = vadd.f32 %v720_v58, %v690_v60  ;;  %v1116_v63 = vpop.f32.mrb[24].mxu0 }
 0x190   : > { %v638_v0 = vpop.f32.mrb[25].mxu0  ;;  %v647_v6 = vadd.f32 %v1116_v63, %v1698_v33 }
 0x191   : > { %v722_v2 = vadd.f32 %v721_v62, %v691_v61  ;;  %v639_v3 = vadd.f32 %v1698_v33, %v638_v0  ;;  %v1117_v4 = vpop.f32.mrb[26].mxu0 }
 0x192   : > { %v641_v5 = vpop.f32.mrb[27].mxu0  ;;  %v650_v11 = vadd.f32 %v1117_v4, %v1698_v33  ;;  %v695_v13 = vmax.f32 %v647_v6, 0.0 }
 0x193   : > { %v693_v7 = vmax.f32 %v639_v3, 0.0  ;;  %v723_v8 = vadd.f32 %v722_v2, %v692_v1  ;;  %v642_v9 = vadd.f32 %v1698_v33, %v641_v5 }
 0x194   : > { %v696_v17 = vmax.f32 %v650_v11, 0.0 }
 0x195   : > { %v724_v10 = vadd.f32 %v723_v8, %v693_v7  ;;  %v694_v12 = vmax.f32 %v642_v9, 0.0 }
 0x197   : > { %v725_v14 = vadd.f32 %v724_v10, %v694_v12  ;;  %v1120_v15 = vpop.f32.mrb[28].mxu0 }
 0x198   : > { %v654_v16 = vpop.f32.mrb[29].mxu0  ;;  %v663_v22 = vadd.f32 %v1120_v15, %v1698_v33 }
 0x199   : > { %v726_v18 = vadd.f32 %v725_v14, %v695_v13  ;;  %v655_v19 = vadd.f32 %v1698_v33, %v654_v16  ;;  %v1121_v20 = vpop.f32.mrb[30].mxu0 }
 0x19a   : > { %v657_v21 = vpop.f32.mrb[31].mxu0  ;;  %v666_v27 = vadd.f32 %v1121_v20, %v1698_v33  ;;  %v699_v29 = vmax.f32 %v663_v22, 0.0 }
 0x19b   : > { %v697_v23 = vmax.f32 %v655_v19, 0.0  ;;  %v727_v24 = vadd.f32 %v726_v18, %v696_v17  ;;  %v658_v25 = vadd.f32 %v1698_v33, %v657_v21 }
 0x19c   : > { %v700_v31 = vmax.f32 %v666_v27, 0.0 }
 0x19d   : > { %v728_v26 = vadd.f32 %v727_v24, %v697_v23  ;;  %v698_v28 = vmax.f32 %v658_v25, 0.0 }
 0x19f   : > { %v729_v30 = vadd.f32 %v728_v26, %v698_v28 }
 0x1a1   : > { %v730_v32 = vadd.f32 %v729_v30, %v699_v29 }
 0x1a3   : > { %v731_v34 = vadd.f32 %v730_v32, %v700_v31 }
 0x1a5   : > { %v732_v35 = vrot.slane %v731_v34, 4 }
 0x1a7   : > { %v733_v36 = vadd.f32 %v732_v35, %v731_v34 }
 0x1a9   : > { %v734_v37 = vrot.slane %v733_v36, 2 }
 0x1ab   : > { %v735_v38 = vadd.f32 %v734_v37, %v733_v36 }
 0x1ad   : > { %v736_v39 = vrot.slane %v735_v38, 1 }
 0x1af   : > { %v737_v40 = vadd.f32 %v736_v39, %v735_v38 }
 0x1b1   : > { %v738_v41 = vmul.f32 0.00390625, %v737_v40 }
 0x1b3   : > { %v740_v42 = vmul.f32 10.0, %v738_v41  ;;  %739 = vst [vmem:[%s307_s19] sm:$0x1] %v738_v41 }
 0x1b5   : > { %v741_v33 = vpack.c.bf16 %v740_v42, %v740_v42 }
 0x1b7   : > { %1139 = vmatmul.mubr.bf16.vlgmr.msra.gmra.mrb[0].mxu1 %v741_v33 }
 0x1b8   : > { %1349 = shalt.err (!%p1346_p1)
}
 0x1b9   : > { %s1350_s12 = scalar_lea.hbm %s1739_s18, 16  ;;  %s1354_s19 = scalar_lea.hbm %s1818_s6, 32 }
 0x1ba   : > { %p1351_p13 = scmp.ne.s32.totalorder %s1739_s18, %s1350_s12  ;;  %p1355_p4 = scmp.lt.u32.totalorder %s1739_s18, %s1818_s6 }
 0x1bb   : > { %p1356_p5 = scmp.lt.u32.totalorder %s1354_s19, %s1350_s12  ;;  %p1358_p11 = scmp.lt.u32.totalorder %s1350_s12, %s1739_s18 }
 0x1bc   : > { %p1352_p6 = pnand %p1351_p13, %p1832_p0 }
 0x1bd   : > { %p1357_p8 = por %p1356_p5, %p1355_p4 }
 0x1be   : > { %p1353_p10 = pneg %p1352_p6 }
 0x1bf   : > { %p1359_p2 = por %p1358_p11, %p1357_p8 }
 0x1c1   : > { %p1360_p3 = pnand %p1359_p2, %p1353_p10 }
 0x1c3   : > { %1363 = shalt.err (!%p1360_p3)
}
 0x1c4   : > { %1153 = dma.vmem_to_hbm [thread:$0]  (%p1832_p0), %s879_s26, 16, %s1739_s18, %s853_s13   ;;  %v758_v43 = vld [vmem:[%s1816_s4] sm:$0x1] }
 0x1c5   : > { %s301_s14 = scalar_lea.vmem [#allocation8], %s1665_s30  ;;  %s1768_s29 = scalar_lea.hbm %s1817_s5, %s1036_s20 }
 0x1c6   : > { %s865_s7 = sshll.u32 %s301_s14, 4  ;;  %s849_s18 = scalar_lea.sflag [#allocation4], %s1665_s30  ;;  %s1770_s7 = int_to_ptr.vmem [resolvable:$true] %s865_s7 }
 0x1c7   : > { %s1364_s26 = scalar_lea.vmem %s1770_s7, 16  ;;  %s1448_s25 = smov [#allocation8]  }
 0x1c8   : > { %p1365_p7 = scmp.ne.s32.totalorder %s1770_s7, %s1364_s26  ;;  %s1368_s13 = sshll.u32 %s1448_s25, 4  ;;  %s1369_s13 = int_to_ptr.vmem [resolvable:$false] %s1368_s13 }
 0x1c9   : > { %s1370_s19 = scalar_lea.vmem %s1369_s13, 32  ;;  %p1371_p1 = scmp.lt.s32.totalorder %s1770_s7, %s1369_s13 }
 0x1ca   : > { %p1366_p9 = pnand %p1365_p7, %p1832_p0  ;;  %p1372_p13 = scmp.lt.s32.totalorder %s1370_s19, %s1364_s26 }
 0x1cc   : > { %p1367_p12 = pneg %p1366_p9  ;;  %p1373_p6 = por %p1372_p13, %p1371_p1 }
 0x1ce   : > { %p1374_p10 = pnand %p1373_p6, %p1367_p12 }
 0x28a   : > { %v841_v44 = vpop.f32.mrb[0].mxu1 }
 0x28b   : > { %v842_v45 = vadd.f32 %v841_v44, %v758_v43  ;;  %v1140_v46 = vpop.f32.mrb[1].mxu1 }
 0x28c   : > { %v844_v47 = vpop.f32.mrb[2].mxu1 }
 0x28d   : > { %847 = vst [vmem:[%s301_s14] sm:$0x1] %v842_v45  ;;  %v1141_v48 = vpop.f32.mrb[3].mxu1 }
 0x28e   : > { %1377 = shalt.err (!%p1374_p10)
}
 0x28f   : > { %s1378_s30 = scalar_lea.hbm %s1768_s29, 16  ;;  %s1382_s17 = scalar_lea.hbm %s1817_s5, 32 }
 0x290   : > { %p1379_p4 = scmp.ne.s32.totalorder %s1768_s29, %s1378_s30  ;;  %p1383_p11 = scmp.lt.u32.totalorder %s1768_s29, %s1817_s5 }
 0x291   : > { %p1384_p2 = scmp.lt.u32.totalorder %s1382_s17, %s1378_s30  ;;  %p1386_p7 = scmp.lt.u32.totalorder %s1378_s30, %s1768_s29 }
 0x292   : > { %p1380_p5 = pnand %p1379_p4, %p1832_p0 }
 0x293   : > { %p1385_p3 = por %p1384_p2, %p1383_p11 }
 0x294   : > { %p1381_p8 = pneg %p1380_p5 }
 0x295   : > { %p1387_p9 = por %p1386_p7, %p1385_p3 }
 0x297   : > { %p1388_p12 = pnand %p1387_p9, %p1381_p8 }
 0x299   : > { %1391 = shalt.err (!%p1388_p12)
}
 0x29a   : > { %1152 = dma.vmem_to_hbm [thread:$0]  (%p1832_p0), %s1770_s7, 16, %s1768_s29, %s849_s18  }
 0x29b PF: > { %s890_s14 = sand.u32 1, %s1426_s21   ;;  %p1833_p1 = scmp.ne.s32.totalorder %s1823_s28, 0 }
 0x29c   : > { %p1834_p13 = scmp.ge.s32.totalorder %s1438_s24, 2  ;;  %s891_s12 = scalar_lea.sflag [#allocation4], %s890_s14 }
 0x29e   : > { %p1168_p6 = pnand %p1834_p13, %p1833_p1 }
 0x2a0   : > { %1417 = dma.done.wait (!%p1168_p6), %s891_s12, 16  }
 0x2a1   : > { %1419 = vsyncadd (!%p1168_p6), %s891_s12, 4294967280  ;;  %s899_s27 = scalar_lea.sflag [#allocation10], %s890_s14 }
 0x2a2   : > { %1421 = dma.done.wait (!%p1168_p6), %s899_s27, 16  }
 0x2a3   : > { %1423 = vsyncadd (!%p1168_p6), %s899_s27, 4294967280  ;;  %p24_p0 = scmp.ge.s32.totalorder %s1600_s8, 4   ;;  %s1835_s21 = smov %s1430_s22 }
 0x2a4   : > { %s1836_s22 = smov %s1434_s23  ;;  %s1837_s23 = smov %s1616_s11 }
 0x2a5   : > { %s1838_s24 = smov %s1600_s8  ;;  %26 = sbr.rel (!%p24_p0) target bundleno = 8 (0x8), region = 110 }
 0x2ac   :  { %903 = vsyncpa [#allocation3], 1 }
 0x2ad   :  { %905 = vsyncpa [#allocation3 + $0x1], 1 }
 0x2ae   :  { %906 = vsyncpa [#allocation6], 1 }
 0x2af   :  { %907 = vsyncpa [#allocation4], 1 }
 0x2b0   :  { %909 = vsyncpa [#allocation4 + $0x1], 1 }
 0x2b1   :  { %910 = vsyncpa [#allocation10], 1 }
 0x2b2   :  { %912 = vsyncpa [#allocation10 + $0x1], 1 }

</bundles_post_ra>
